<compile_context>
chip_gen: v7x
topology: tpu7x:2x2x1
jax: 0.10.0
libtpu: 0.0.40
codegen_flags: <defaults>
</compile_context>

<pallas_src>
import functools

import jax
import jax.numpy as jnp
from jax import lax
from jax.experimental import pallas as pl
from jax.experimental.pallas import tpu as pltpu


def _round_up(x, m):
    return ((x + m - 1) // m) * m


# --------------------------------------------------------------------------
# Fused PreNorm + Linear kernel.
#   grid = (row tiles [parallel], output-column tiles [arbitrary])
#   xn cache: VMEM scratch (tm, D) in the MXU compute dtype, filled at j == 0.
# --------------------------------------------------------------------------
def _prenorm_linear_kernel(x_ref, w_ref, bias_ref, o_ref, xn_ref, *, eps):
    @pl.when(pl.program_id(1) == 0)
    def _():
        x = x_ref[...].astype(jnp.float32)
        mean = jnp.mean(x, axis=-1, keepdims=True)
        centered = x - mean
        var = jnp.mean(centered * centered, axis=-1, keepdims=True)  # biased, like torch
        inv = lax.rsqrt(var + eps)
        xn_ref[...] = (centered * inv).astype(xn_ref.dtype)

    acc = jnp.dot(xn_ref[...], w_ref[...], preferred_element_type=jnp.float32)
    acc = acc + bias_ref[...].astype(jnp.float32)
    o_ref[...] = acc.astype(o_ref.dtype)


def prenorm_linear_pallas(x2d, w_p, bias_p, *, eps=1e-5,
                          tile_rows=256, tile_cols=256,
                          vmem_budget_bytes=24 << 20):
    """Fused fn(norm(x)) for fn = Linear, gamma/beta already folded into w_p/bias_p.

    x2d: (R, D); w_p: (D, Hp) with Hp % 128 == 0 (compute dtype, e.g. bf16);
    bias_p: (1, Hp) f32.  Returns (R, Hp) in x2d.dtype.
    """
    R, D = x2d.shape
    D_w, Hp = w_p.shape
    assert D_w == D and Hp % 128 == 0

    x_sz = jnp.dtype(x2d.dtype).itemsize
    w_sz = jnp.dtype(w_p.dtype).itemsize
    o_sz = x_sz

    tm = min(_round_up(tile_rows, 8), _round_up(R, 8))
    tn = min(_round_up(tile_cols, 128), Hp)

    def vmem_need(tm_, tn_):
        return (2 * tm_ * D * x_sz      # x, double-buffered
                + 2 * D * tn_ * w_sz    # W, double-buffered
                + 2 * tn_ * 4           # bias
                + 2 * tm_ * tn_ * o_sz  # out, double-buffered
                + tm_ * D * w_sz)       # xn cache (scratch)

    while vmem_need(tm, tn) > vmem_budget_bytes and tn > 128:
        tn = max(128, tn // 2)
    while vmem_need(tm, tn) > vmem_budget_bytes and tm > 8:
        tm = max(8, tm // 2)

    grid = (pl.cdiv(R, tm), pl.cdiv(Hp, tn))
    vmem_limit = int(min(64 << 20, max(2 * vmem_need(tm, tn), 16 << 20)))

    cost = pl.CostEstimate(
        flops=2 * R * D * Hp,
        transcendentals=R,                                  # one rsqrt per row
        bytes_accessed=(R * D * x_sz                        # x read once
                        + grid[0] * (D * Hp * w_sz + Hp * 4)  # W/bias per row tile
                        + R * Hp * o_sz),                   # output write
    )

    return pl.pallas_call(
        functools.partial(_prenorm_linear_kernel, eps=eps),
        out_shape=jax.ShapeDtypeStruct((R, Hp), x2d.dtype),
        grid_spec=pltpu.PrefetchScalarGridSpec(
            num_scalar_prefetch=0,
            grid=grid,
            in_specs=[
                pl.BlockSpec((tm, D), lambda i, j: (i, 0)),   # x rows (reused over j)
                pl.BlockSpec((D, tn), lambda i, j: (0, j)),   # folded weight columns
                pl.BlockSpec((1, tn), lambda i, j: (0, j)),   # folded bias columns
            ],
            out_specs=pl.BlockSpec((tm, tn), lambda i, j: (i, j)),
            scratch_shapes=[pltpu.VMEM((tm, D), w_p.dtype)],  # xn cache
        ),
        compiler_params=pltpu.CompilerParams(
            dimension_semantics=("parallel", "arbitrary"),
            vmem_limit_bytes=vmem_limit),
        cost_estimate=cost,
    )(x2d, w_p, bias_p)


# --------------------------------------------------------------------------
# Standalone LayerNorm kernel (fallback when PreNorm wraps an arbitrary fn).
# --------------------------------------------------------------------------
def _layernorm_kernel(x_ref, g_ref, b_ref, o_ref, *, eps):
    x = x_ref[...].astype(jnp.float32)
    mean = jnp.mean(x, axis=-1, keepdims=True)
    centered = x - mean
    var = jnp.mean(centered * centered, axis=-1, keepdims=True)
    xn = centered * lax.rsqrt(var + eps)
    o_ref[...] = (xn * g_ref[...] + b_ref[...]).astype(o_ref.dtype)


def layernorm_pallas(x2d, gamma2d, beta2d, *, eps=1e-5, tile_rows=512,
                     vmem_budget_bytes=24 << 20):
    """x2d: (R, D); gamma2d/beta2d: (1, D) f32.  Returns (R, D)."""
    R, D = x2d.shape
    x_sz = jnp.dtype(x2d.dtype).itemsize

    tm = min(_round_up(tile_rows, 8), _round_up(R, 8))

    def vmem_need(tm_):
        return 2 * tm_ * D * x_sz * 2 + 2 * D * 4 * 2   # x + out double-buffered

    while vmem_need(tm) > vmem_budget_bytes and tm > 8:
        tm = max(8, tm // 2)

    vmem_limit = int(min(64 << 20, max(2 * vmem_need(tm), 16 << 20)))

    return pl.pallas_call(
        functools.partial(_layernorm_kernel, eps=eps),
        out_shape=jax.ShapeDtypeStruct((R, D), x2d.dtype),
        grid_spec=pltpu.PrefetchScalarGridSpec(
            num_scalar_prefetch=0,
            grid=(pl.cdiv(R, tm),),
            in_specs=[
                pl.BlockSpec((tm, D), lambda i: (i, 0)),
                pl.BlockSpec((1, D), lambda i: (0, 0)),
                pl.BlockSpec((1, D), lambda i: (0, 0)),
            ],
            out_specs=pl.BlockSpec((tm, D), lambda i: (i, 0)),
        ),
        compiler_params=pltpu.CompilerParams(
            dimension_semantics=("parallel",),
            vmem_limit_bytes=vmem_limit),
    )(x2d, gamma2d, beta2d)


# --------------------------------------------------------------------------
# PreNorm wrapper: fn(norm(x), **kwargs)
# --------------------------------------------------------------------------
class PallasLinear:
    """Linear(dim -> hidden).  When wrapped by PreNormPallas the LayerNorm is
    fused into the matmul kernel and gamma/beta are folded into W/bias."""

    def __init__(self, w, b, compute_dtype=jnp.bfloat16):
        self.w = w                        # (D, H)
        self.b = b                        # (H,)
        self.compute_dtype = compute_dtype  # MXU feed dtype (bf16 recommended)


class PreNormPallas:
    def __init__(self, dim, fn, gamma, beta, eps=1e-5):
        self.dim = dim
        self.fn = fn
        self.eps = eps
        # Pre-cast for the generic fallback path (done once, not per call).
        self.gamma2d = gamma.reshape(1, dim).astype(jnp.float32)
        self.beta2d = beta.reshape(1, dim).astype(jnp.float32)

        if isinstance(fn, PallasLinear):
            D, H = fn.w.shape
            assert D == dim
            Hp = _round_up(H, 128)
            gamma_f = gamma.astype(jnp.float32)
            beta_f = beta.astype(jnp.float32)
            w_f = fn.w.astype(jnp.float32)
            b_f = fn.b.astype(jnp.float32)
            # Fold:  (xn*gamma + beta) @ W + b  ==  xn @ (gamma[:,None]*W) + (beta@W + b)
            w_folded = (gamma_f[:, None] * w_f).astype(fn.compute_dtype)
            bias_folded = (beta_f @ w_f + b_f).astype(jnp.float32)
            if Hp != H:   # pad ONCE at construction for lane-dense output stores
                w_folded = jnp.pad(w_folded, ((0, 0), (0, Hp - H)))
                bias_folded = jnp.pad(bias_folded, (0, Hp - H))
            self._w_folded = w_folded
            self._bias_folded = bias_folded.reshape(1, Hp)
            self._H = H

    def __call__(self, x, **kwargs):
        B, S, D = x.shape
        assert D == self.dim
        x2d = x.reshape(B * S, D)
        if isinstance(self.fn, PallasLinear):
            y2d = prenorm_linear_pallas(
                x2d, self._w_folded, self._bias_folded, eps=self.eps)
            return y2d[:, :self._H].reshape(B, S, self._H)
        # General path: standalone Pallas LayerNorm, then arbitrary fn.
        xn = layernorm_pallas(x2d, self.gamma2d, self.beta2d, eps=self.eps)
        return self.fn(xn.reshape(B, S, D), **kwargs)


# --------------------------------------------------------------------------
# Pure-JAX references
# --------------------------------------------------------------------------
def _reference_layernorm(x, gamma, beta, eps=1e-5):
    mean = jnp.mean(x, axis=-1, keepdims=True)
    var = jnp.mean((x - mean) ** 2, axis=-1, keepdims=True)
    return (x - mean) / jnp.sqrt(var + eps) * gamma + beta


def _reference_prenorm(x, gamma, beta, w, b, eps=1e-5):
    xn = _reference_layernorm(x, gamma, beta, eps)
    return jnp.einsum("bsd,dh->bsh", xn, w) + b


if __name__ == "__main__":
    B, S, D, H = 2, 8, 32, 64
    key = jax.random.PRNGKey(0)
    kx, kg, kb, kw, kbias = jax.random.split(key, 5)

    x = jax.random.normal(kx, (B, S, D), dtype=jnp.float32)

    # Deterministic parameter init (synthetic, not a checkpoint load).
    gamma = 1.0 + 0.1 * jax.random.normal(kg, (D,), dtype=jnp.float32)
    beta = 0.1 * jax.random.normal(kb, (D,), dtype=jnp.float32)
    w = jax.random.normal(kw, (D, H), dtype=jnp.float32) / jnp.sqrt(D)
    bias = 0.1 * jax.random.normal(kbias, (H,), dtype=jnp.float32)

    ref = _reference_prenorm(x, gamma, beta, w, bias)

    # Fused PreNorm + Linear, f32 MXU feed (tight tolerance check).
    prenorm_f32 = PreNormPallas(
        D, PallasLinear(w, bias, compute_dtype=jnp.float32), gamma, beta)
    out_f32 = jax.block_until_ready(prenorm_f32(x))
    assert out_f32.shape == (B, S, H)
    assert jnp.allclose(out_f32, ref, atol=1e-4, rtol=1e-4), "fused prenorm (f32) mismatch"

    # Fused PreNorm + Linear, bf16 MXU feed (default; looser tolerance,
    # gamma/beta folding + bf16 operands change low-order bits).
    prenorm_bf16 = PreNormPallas(D, PallasLinear(w, bias), gamma, beta)
    out_bf16 = jax.block_until_ready(prenorm_bf16(x))
    assert out_bf16.shape == (B, S, H)
    assert jnp.allclose(out_bf16.astype(jnp.float32), ref, atol=3e-2, rtol=3e-2), \
        "fused prenorm (bf16) mismatch"

    # Standalone LayerNorm fallback path.
    ln = jax.block_until_ready(
        layernorm_pallas(x.reshape(B * S, D),
                         gamma.reshape(1, D).astype(jnp.float32),
                         beta.reshape(1, D).astype(jnp.float32))).reshape(B, S, D)
    ln_ref = _reference_layernorm(x, gamma, beta)
    assert jnp.allclose(ln, ln_ref, atol=1e-4, rtol=1e-4), "layernorm mismatch"

    print("KERNEL_OK")
</pallas_src>

<mosaic_0001>
module attributes {stable_mosaic.version = 11 : i64} {
  func.func @_prenorm_linear_kernel(%arg0: i32, %arg1: i32, %arg2: memref<16x32xf32, #tpu.memory_space<vmem>>, %arg3: memref<32x128xf32, #tpu.memory_space<vmem>>, %arg4: memref<1x128xf32, #tpu.memory_space<vmem>>, %arg5: memref<16x128xf32, #tpu.memory_space<vmem>>, %arg6: memref<16x32xf32, #tpu.memory_space<vmem>>) attributes {dimension_semantics = [#tpu.dimension_semantics<parallel>, #tpu.dimension_semantics<arbitrary>], iteration_bounds = array<i64: 1, 1>, scalar_prefetch = 0 : i64, scratch_operands = 1 : i64, tpu.core_type = #tpu.core_type<tc>, window_params = [{transform_indices = @transform_0, window_bounds = array<i64: 16, 32>}, {transform_indices = @transform_1, window_bounds = array<i64: 32, 128>}, {transform_indices = @transform_2, window_bounds = array<i64: 1, 128>}, {transform_indices = @transform_3, window_bounds = array<i64: 16, 128>}]} {
    %c0_i32 = arith.constant 0 : i32
    %0 = arith.cmpi eq, %arg1, %c0_i32 : i32
    %1 = arith.extui %0 : i1 to i32
    %c0_i32_0 = arith.constant 0 : i32
    %2 = arith.cmpi ne, %1, %c0_i32_0 : i32
    scf.if %2 {
      %c0_8 = arith.constant 0 : index
      %c0_9 = arith.constant 0 : index
      %10 = vector.load %arg2[%c0_8, %c0_9] : memref<16x32xf32, #tpu.memory_space<vmem>>, vector<16x32xf32>
      %cst_10 = arith.constant dense<0.000000e+00> : vector<16xf32>
      %11 = vector.multi_reduction <add>, %10, %cst_10 [1] : vector<16x32xf32> to vector<16xf32>
      %12 = vector.shape_cast %11 : vector<16xf32> to vector<16x1xf32>
      %cst_11 = arith.constant 3.200000e+01 : f32
      %13 = vector.broadcast %cst_11 : f32 to vector<16x1xf32>
      %14 = arith.divf %12, %13 : vector<16x1xf32>
      %15 = vector.broadcast %14 : vector<16x1xf32> to vector<16x32xf32>
      %16 = arith.subf %10, %15 : vector<16x32xf32>
      %17 = arith.mulf %16, %16 : vector<16x32xf32>
      %cst_12 = arith.constant dense<0.000000e+00> : vector<16xf32>
      %18 = vector.multi_reduction <add>, %17, %cst_12 [1] : vector<16x32xf32> to vector<16xf32>
      %19 = vector.shape_cast %18 : vector<16xf32> to vector<16x1xf32>
      %cst_13 = arith.constant 3.200000e+01 : f32
      %20 = vector.broadcast %cst_13 : f32 to vector<16x1xf32>
      %21 = arith.divf %19, %20 : vector<16x1xf32>
      %cst_14 = arith.constant 9.99999974E-6 : f32
      %22 = vector.broadcast %cst_14 : f32 to vector<16x1xf32>
      %23 = arith.addf %21, %22 : vector<16x1xf32>
      %24 = math.rsqrt %23 : vector<16x1xf32>
      %25 = vector.broadcast %24 : vector<16x1xf32> to vector<16x32xf32>
      %26 = arith.mulf %16, %25 : vector<16x32xf32>
      %c0_15 = arith.constant 0 : index
      %c0_16 = arith.constant 0 : index
      %27 = vector.load %arg6[%c0_15, %c0_16] : memref<16x32xf32, #tpu.memory_space<vmem>>, vector<16x32xf32>
      tpu.vector_store %arg6[%c0_15, %c0_16], %26 {strides = array<i32>} : memref<16x32xf32, #tpu.memory_space<vmem>>, vector<16x32xf32>,
    } else {
    }
    %c0 = arith.constant 0 : index
    %c0_1 = arith.constant 0 : index
    %3 = vector.load %arg6[%c0, %c0_1] : memref<16x32xf32, #tpu.memory_space<vmem>>, vector<16x32xf32>
    %c0_2 = arith.constant 0 : index
    %c0_3 = arith.constant 0 : index
    %4 = vector.load %arg3[%c0_2, %c0_3] : memref<32x128xf32, #tpu.memory_space<vmem>>, vector<32x128xf32>
    %cst = arith.constant dense<0.000000e+00> : vector<16x128xf32>
    %5 = tpu.matmul %3, %4, %cst {dimension_numbers = #tpu.dot_dimension_numbers<[1], [0], [0], [1], [0, 0, 1, 1], [], []>} : vector<16x32xf32>, vector<32x128xf32>, vector<16x128xf32> -> vector<16x128xf32>
    %c0_4 = arith.constant 0 : index
    %c0_5 = arith.constant 0 : index
    %6 = vector.load %arg4[%c0_4, %c0_5] : memref<1x128xf32, #tpu.memory_space<vmem>>, vector<1x128xf32>
    %7 = vector.broadcast %6 : vector<1x128xf32> to vector<16x128xf32>
    %8 = arith.addf %5, %7 : vector<16x128xf32>
    %c0_6 = arith.constant 0 : index
    %c0_7 = arith.constant 0 : index
    %9 = vector.load %arg5[%c0_6, %c0_7] : memref<16x128xf32, #tpu.memory_space<vmem>>, vector<16x128xf32>
    tpu.vector_store %arg5[%c0_6, %c0_7], %8 {strides = array<i32>} : memref<16x128xf32, #tpu.memory_space<vmem>>, vector<16x128xf32>,
    return
  }
  func.func @transform_0(%arg0: i32, %arg1: i32) -> (i32, i32) {
    %c0_i32 = arith.constant 0 : i32
    %c0_i32_0 = arith.constant 0 : i32
    return %arg0, %c0_i32 : i32, i32
  }
  func.func @transform_1(%arg0: i32, %arg1: i32) -> (i32, i32) {
    %c0_i32 = arith.constant 0 : i32
    %c0_i32_0 = arith.constant 0 : i32
    return %c0_i32, %arg1 : i32, i32
  }
  func.func @transform_2(%arg0: i32, %arg1: i32) -> (i32, i32) {
    %c0_i32 = arith.constant 0 : i32
    %c0_i32_0 = arith.constant 0 : i32
    return %c0_i32, %arg1 : i32, i32
  }
  func.func @transform_3(%arg0: i32, %arg1: i32) -> (i32, i32) {
    %c0_i32 = arith.constant 0 : i32
    return %arg0, %arg1 : i32, i32
  }
}

</mosaic_0001>

<bundles_post_ra>
// kernel: tpu_custom_call.1
= control target key start
LH: loop header
LB: loop body
LE: loop exit
PB: predicated region body
PF: predicated region fallthrough
CT: control target
= control target key end

     0   :  { %8 = vsyncpa [#allocation4], 0  ;;  %s384_s0 = inlined_call_operand.hbm [shape: f32[16,32], index: 0, kind: input, shape index: {}]   ;;  %s385_s1 = inlined_call_operand.hbm [shape: f32[32,128], index: 1, kind: input, shape index: {}]   ;;  %s386_s2 = inlined_call_operand.vmem [shape: f32[1,128], index: 2, kind: input, shape index: {}]   ;;  %s387_s3 = inlined_call_operand.hbm [shape: f32[16,128], index: 3, kind: output, shape index: {}]  }
   0x1   :  { %9 = vsyncpa [#allocation7], 0 }
   0x2   :  { %10 = vsyncpa [#allocation5], 0  ;;  %s303_s12 = smov [#allocation3]   ;;  %s231_s16 = scalar_lea.hbm %s384_s0, 256 }
   0x3   :  { %s16_s13 = sshll.u32 %s303_s12, 4  ;;  %p232_p0 = scmp.ne.s32.totalorder %s384_s0, %s231_s16  ;;  %s17_s13 = int_to_ptr.vmem [resolvable:$true] %s16_s13 }
   0x4   :  { %p235_p1 = scmp.lt.u32.totalorder %s231_s16, %s384_s0 }
   0x6   :  { %p237_p2 = pnand %p235_p1, %p232_p0 }
   0x8   :  { %240 = shalt.err (!%p237_p2)
}
   0x9   :  { %s241_s21 = scalar_lea.vmem %s17_s13, 256  ;;  %p246_p4 = scmp.lt.s32.totalorder %s17_s13, %s17_s13 }
   0xa   :  { %p242_p3 = scmp.ne.s32.totalorder %s17_s13, %s241_s21  ;;  %p247_p5 = scmp.lt.s32.totalorder %s241_s21, %s241_s21 }
   0xc   :  { %p248_p6 = por %p247_p5, %p246_p4 }
   0xe   :  { %p249_p7 = pnand %p248_p6, %p242_p3 }
  0x10   :  { %252 = shalt.err (!%p249_p7)
}
  0x11   :  { %s304_s22 = smov 128   ;;  %s305_s23 = smov 8  }
  0x12   :  { %22 = dma.hbm_to_vmem [thread:$0]  %s384_s0, 256, %s17_s13, [#allocation4], %s304_s22, %s304_s22, %s305_s23  }
  0x13   :  { %s306_s26 = smov [#allocation6]   ;;  %s253_s30 = scalar_lea.hbm %s385_s1, 512 }
  0x14   :  { %s28_s27 = sshll.u32 %s306_s26, 4  ;;  %p254_p8 = scmp.ne.s32.totalorder %s385_s1, %s253_s30  ;;  %s29_s27 = int_to_ptr.vmem [resolvable:$true] %s28_s27 }
  0x15   :  { %p257_p9 = scmp.lt.u32.totalorder %s253_s30, %s385_s1 }
  0x17   :  { %p259_p10 = pnand %p257_p9, %p254_p8 }
  0x19   :  { %262 = shalt.err (!%p259_p10)
}
  0x1a   :  { %s263_s8 = scalar_lea.vmem %s29_s27, 512  ;;  %p268_p12 = scmp.lt.s32.totalorder %s29_s27, %s29_s27 }
  0x1b   :  { %p264_p11 = scmp.ne.s32.totalorder %s29_s27, %s263_s8  ;;  %p269_p13 = scmp.lt.s32.totalorder %s263_s8, %s263_s8 }
  0x1d   :  { %p270_p0 = por %p269_p13, %p268_p12 }
  0x1f   :  { %p271_p1 = pnand %p270_p0, %p264_p11 }
  0x21   :  { %274 = shalt.err (!%p271_p1)
}
  0x22   :  { %34 = dma.hbm_to_vmem [thread:$0]  %s385_s1, 512, %s29_s27, [#allocation7], %s304_s22, %s304_s22, %s305_s23  }
  0x23   :  { %297 = dma.done.wait [#allocation4], 256  }
  0x24   :  { %298 = vsyncadd [#allocation4], 4294967040 }
  0x25   :  { %299 = dma.done.wait [#allocation7], 512  }
  0x26   :  { %300 = vsyncadd [#allocation7], 4294966784  ;;  %vm49_vm0 = vcmask 261120   ;;  %v47_v0 = vld [vmem:[#allocation3] sm:$0xff]  ;;  %v48_v1 = vld [vmem:[#allocation3 + $0x8] sm:$0xff]  ;;  %s307_s11 = smov [#allocation8]  }
  0x27   :  { %v50_v2 = vsel %vm49_vm0, %v47_v0, 0.0  ;;  %v53_v3 = vsel %vm49_vm0, %v48_v1, 0.0  ;;  %v81_v14 = vld [vmem:[#allocation6] sm:$0xff]  ;;  %v82_v15 = vld [vmem:[#allocation6 + $0x8] sm:$0xff]  ;;  %v83_v17 = vld [vmem:[#allocation6 + $0x10] sm:$0xff]  ;;  %s181_s12 = sshll.u32 %s307_s11, 4  ;;  %s182_s12 = int_to_ptr.vmem [resolvable:$true] %s181_s12 }
  0x28   :  { %51 = vadd.xlane.f32.xlu0 %v50_v2  ;;  %v214_v16 = vpack.c.bf16 %v82_v15, %v81_v14  ;;  %v84_v18 = vld [vmem:[#allocation6 + $0x18] sm:$0xff]  ;;  %v194_v32 = vld [vmem:[%s386_s2] ss:$0 sm:$0xff]  ;;  %s275_s13 = scalar_lea.vmem %s182_s12, 256  ;;  %p280_p3 = scmp.lt.s32.totalorder %s182_s12, %s182_s12 }
  0x29   :  { %v218_v19 = vpack.c.bf16 %v84_v18, %v83_v17  ;;  %p276_p2 = scmp.ne.s32.totalorder %s182_s12, %s275_s13  ;;  %p281_p4 = scmp.lt.s32.totalorder %s275_s13, %s275_s13 }
  0x2a   :  { %215 = vmatprep.subr.bf16.mxu0 %v214_v16 }
  0x2b   :  { %217 = vmatpush3.bf16.msra.mxu0 %v214_v16  ;;  %p282_p5 = por %p281_p4, %p280_p3 }
  0x2c   :  { %54 = vadd.xlane.f32.xlu0 %v53_v3  ;;  %219 = vmatprep.subr.bf16.mxu0 %v218_v19 }
  0x2d   :  { %p283_p6 = pnand %p282_p5, %p276_p2 }
  0x2f   :  { %221 = vmatpush3.bf16.msra.mxu0 %v218_v19 }
  0xb5   :  { %v52_v4 = vpop.xlane.xlu0 %51 }
  0xb6   :  { %v57_v5 = vmul.f32 0.03125, %v52_v4 }
  0xb8   :  { %v59_v6 = vsub.f32 %v47_v0, %v57_v5 }
  0xb9   :  { %v55_v7 = vpop.xlane.xlu0 %54 }
  0xba   :  { %v58_v8 = vmul.f32 0.03125, %v55_v7  ;;  %v61_v9 = vmul.f32 %v59_v6, %v59_v6 }
  0xbc   :  { %v60_v10 = vsub.f32 %v48_v1, %v58_v8  ;;  %v63_v11 = vsel %vm49_vm0, %v61_v9, 0.0 }
  0xbd   :  { %64 = vadd.xlane.f32.xlu1 %v63_v11 }
  0xbe   :  { %v62_v12 = vmul.f32 %v60_v10, %v60_v10 }
  0xc0   :  { %v66_v13 = vsel %vm49_vm0, %v62_v12, 0.0 }
  0xc1   :  { %67 = vadd.xlane.f32.xlu1 %v66_v13 }
 0x14a   :  { %v65_v20 = vpop.xlane.xlu1 %64 }
 0x14b   :  { %v69_v21 = vmul.f32 0.03125, %v65_v20 }
 0x14d   :  { %v71_v22 = vadd.f32 1e-05, %v69_v21 }
 0x14e   :  { %v68_v23 = vpop.xlane.xlu1 %67 }
 0x14f   :  { %227 = vrsqrt.f32 %v71_v22  ;;  %v70_v24 = vmul.f32 0.03125, %v68_v23 }
 0x151   :  { %v72_v25 = vadd.f32 1e-05, %v70_v24 }
 0x153   :  { %229 = vrsqrt.f32 %v72_v25 }
 0x159   :  { %v228_v26 = vpop.eup %227 }
 0x15a   :  { %v75_v27 = vmul.f32 %v228_v26, %v59_v6 }
 0x15c   :  { %77 = vst.msk [vmem:[#allocation2] sm:$0xff] %vm49_vm0, %v75_v27 }
 0x15d   :  { %v230_v28 = vpop.eup %229 }
 0x15e   :  { %v76_v29 = vmul.f32 %v230_v28, %v60_v10 }
 0x160   :  { %78 = vst.msk [vmem:[#allocation2 + $0x8] sm:$0xff] %vm49_vm0, %v76_v29 }
 0x163   :  { %v79_v30 = vld [vmem:[#allocation2] sm:$0xff] }
 0x164   :  { %211 = vmatprep.mubr.msk.f32.mxu0 %vm49_vm0, %v79_v30 }
 0x167   :  { %v80_v31 = vld [vmem:[#allocation2 + $0x8] sm:$0xff] }
 0x168   :  { %212 = vmatmul.mubr.msk.f32.vlgmr.msra.gmra.mrb[0].mxu0 %vm49_vm0, %v80_v31 }
 0x23b   :  { %v213_v33 = vpop.f32.mrb[0].mxu0 }
 0x23c   :  { %v171_v34 = vadd.f32 %v213_v33, %v194_v32  ;;  %v165_v35 = vpop.f32.mrb[1].mxu0 }
 0x23d   :  { %v166_v36 = vadd.f32 %v194_v32, %v165_v35 }
 0x23e   :  { %175 = vst [vmem:[#allocation8 + $0x8] sm:$0xff] %v171_v34 }
 0x23f   :  { %174 = vst [vmem:[#allocation8] sm:$0xff] %v166_v36 }
 0x240   :  { %286 = shalt.err (!%p283_p6)
}
 0x241   :  { %s287_s2 = scalar_lea.hbm %s387_s3, 256 }
 0x242   :  { %p288_p7 = scmp.ne.s32.totalorder %s387_s3, %s287_s2  ;;  %p291_p8 = scmp.lt.u32.totalorder %s287_s2, %s387_s3 }
 0x244   :  { %p293_p9 = pnand %p291_p8, %p288_p7 }
 0x246   :  { %296 = shalt.err (!%p293_p9)
}
 0x247   :  { %187 = dma.vmem_to_hbm [thread:$0]  %s182_s12, 256, %s387_s3, [#allocation5], %s304_s22, %s304_s22, %s305_s23  }
 0x248   :  { %301 = dma.done.wait [#allocation5], 256  }
 0x249   :  { %302 = vsyncadd [#allocation5], 4294967040 }
 0x24a   :  { %191 = vsyncpa [#allocation4], 1 }
 0x24b   :  { %192 = vsyncpa [#allocation7], 1 }
 0x24c   :  { %193 = vsyncpa [#allocation5], 1 }

</bundles_post_ra>
